<compile_context>
chip_gen: v7x
topology: tpu7x:2x2x1
jax: 0.10.0
libtpu: 0.0.40
codegen_flags: <defaults>
</compile_context>

<pallas_src>
import functools

import jax
import jax.numpy as jnp
from jax import lax
from jax.experimental import pallas as pl
from jax.experimental.pallas import tpu as pltpu

_TILE_BUDGET = 2 * 1024 * 1024      # target per-block bytes (0.5-2 MiB ~ HBM roofline)
_VMEM_LIMIT = 32 * 1024 * 1024      # <= scoped/physical VMEM on v5e / v6e / v7x


def _pick_lanes(D, H, W):
    # Lane-dense stores are the biggest store-path lever: prefer a trailing flatten
    # that is a multiple of 128.  Falls back to H*W (still legal: full-dim block).
    for lanes in (H * W, W, D * H * W):
        if lanes % 128 == 0:
            return lanes
    return H * W


def _mosaic_params(block_bytes, semantics):
    # 2x input + 2x output double-buffered blocks plus headroom for compute temps.
    need = 10 * block_bytes
    return pltpu.CompilerParams(
        dimension_semantics=semantics,
        vmem_limit_bytes=int(max(_VMEM_LIMIT, need)))


# --------------------------------------------------------------------------------------
# Kernels.  params_ref is a flat SMEM table: [scale/weight, shift/bias] per pseudo-
# channel p in [0, 2C): index 2*p and 2*p+1.
# --------------------------------------------------------------------------------------
def _train_single_kernel(params_ref, x_ref, o_ref, *, count, eps):
    """Whole (plane, channel) per grid step: 1 read + 1 write, stats in VMEM."""
    p = pl.program_id(0)
    x = x_ref[...]                                   # (1, rows, lanes) f32
    inv_cnt = 1.0 / count
    mean = jnp.sum(x) * inv_cnt
    # One-pass variance (no centered temp).  f32 accumulation; clamp tiny negatives.
    var = jnp.maximum(jnp.sum(x * x) * inv_cnt - mean * mean, 0.0)
    scale = params_ref[2 * p] * lax.rsqrt(var + eps)
    shift = params_ref[2 * p + 1] - mean * scale
    o_ref[...] = x * scale + shift


def _train_tiled_kernel(params_ref, x_ref, o_ref, s_ref, ss_ref, *,
                        count, eps, rows_total, rows_per_tile):
    """Two-phase per (plane, channel): phase 0 accumulates sum / sumsq over row tiles,
    phase 1 normalizes tile-by-tile.  Bounds VMEM for large 3-D volumes."""
    p = pl.program_id(0)
    ph = pl.program_id(1)
    t = pl.program_id(2)

    @pl.when(jnp.logical_and(ph == 0, t == 0))
    def _():
        s_ref[...] = jnp.zeros_like(s_ref)
        ss_ref[...] = jnp.zeros_like(ss_ref)

    @pl.when(ph == 0)
    def _():
        x = x_ref[...]                               # (1, rows_per_tile, lanes)
        row = lax.broadcasted_iota(jnp.int32, x.shape, 1) + t * rows_per_tile
        xv = jnp.where(row < rows_total, x, 0.0)     # mask padded rows of last tile
        s_ref[...] = s_ref[...] + jnp.sum(xv)
        ss_ref[...] = ss_ref[...] + jnp.sum(xv * xv)

    @pl.when(jnp.logical_and(ph == 1, t == 0))
    def _():
        inv_cnt = 1.0 / count
        mean = s_ref[...] * inv_cnt
        var = jnp.maximum(ss_ref[...] * inv_cnt - mean * mean, 0.0)
        scale = params_ref[2 * p] * lax.rsqrt(var + eps)
        s_ref[...] = scale                            # cache scale/shift for phase 1
        ss_ref[...] = params_ref[2 * p + 1] - mean * scale

    @pl.when(ph == 1)
    def _():
        o_ref[...] = x_ref[...] * s_ref[...] + ss_ref[...]


def _eval_kernel(params_ref, x_ref, o_ref):
    """Eval mode: per-(plane, channel) scale/shift folded in the wrapper; elementwise."""
    p = pl.program_id(0)
    o_ref[...] = x_ref[...] * params_ref[2 * p] + params_ref[2 * p + 1]


# --------------------------------------------------------------------------------------
# Wrapper.
# --------------------------------------------------------------------------------------
def cbatchnorm3d(x, weight_r, bias_r, weight_i, bias_i, *,
                 eps=1e-5, training=True,
                 running_mean_r=None, running_var_r=None,
                 running_mean_i=None, running_var_i=None,
                 tile_budget_bytes=_TILE_BUDGET):
    """Forward of cBatchNorm3d. x: complex64 (N, C, D, H, W) -> complex64 same shape."""
    N, C, D, H, W = x.shape
    P = 2 * C
    lanes = _pick_lanes(D, H, W)
    rows = (N * D * H * W) // lanes            # rows per pseudo-channel
    count = N * D * H * W                      # reduction count per plane per channel

    # Planar, channel-major view (2*C, rows, lanes).  real/imag extraction is required
    # by the complex64 contract; the transpose + flatten fold into that same XLA fusion
    # (one HBM read of x, one write of the planar buffer) when this wrapper is jitted.
    xp = jnp.stack([jnp.real(x), jnp.imag(x)], axis=0)        # (2, N, C, D, H, W)
    xp = jnp.transpose(xp, (0, 2, 1, 3, 4, 5))                # (2, C, N, D, H, W)
    xp = xp.reshape(P, rows, lanes).astype(jnp.float32)

    # Flat 1-D scalar table: [w, b] (training) or [scale, shift] (eval) per pseudo-ch.
    if training:
        w_all = jnp.concatenate([weight_r, weight_i])
        b_all = jnp.concatenate([bias_r, bias_i])
    else:
        inv_r = weight_r * lax.rsqrt(running_var_r + eps)
        inv_i = weight_i * lax.rsqrt(running_var_i + eps)
        w_all = jnp.concatenate([inv_r, inv_i])
        b_all = jnp.concatenate([bias_r - running_mean_r * inv_r,
                                 bias_i - running_mean_i * inv_i])
    params = jnp.stack([w_all, b_all], axis=1).reshape(-1).astype(jnp.float32)  # (2P,)

    bytes_per_row = lanes * 4
    channel_bytes = rows * bytes_per_row

    def _row_tile():
        r = max(1, tile_budget_bytes // bytes_per_row)
        if r >= rows:
            return rows
        return min(rows, max(8, (r // 8) * 8))   # multiple of 8 or full dim

    out_shape = jax.ShapeDtypeStruct((P, rows, lanes), jnp.float32)

    if not training:
        rb = _row_tile()
        nt = pl.cdiv(rows, rb)
        spec = pl.BlockSpec((1, rb, lanes), lambda p, t, prm: (p, t, 0))
        out = pl.pallas_call(
            _eval_kernel,
            grid_spec=pltpu.PrefetchScalarGridSpec(
                num_scalar_prefetch=1, grid=(P, nt),
                in_specs=[spec], out_specs=spec),
            out_shape=out_shape,
            compiler_params=_mosaic_params(rb * bytes_per_row,
                                           ("parallel", "parallel")),
        )(params, xp)
    elif channel_bytes <= tile_budget_bytes:
        # Whole channel per step: single sweep, 1 read + 1 write.
        spec = pl.BlockSpec((1, rows, lanes), lambda p, prm: (p, 0, 0))
        kern = functools.partial(_train_single_kernel,
                                 count=float(count), eps=float(eps))
        out = pl.pallas_call(
            kern,
            grid_spec=pltpu.PrefetchScalarGridSpec(
                num_scalar_prefetch=1, grid=(P,),
                in_specs=[spec], out_specs=spec),
            out_shape=out_shape,
            compiler_params=_mosaic_params(channel_bytes, ("parallel",)),
        )(params, xp)
    else:
        # Large channel: two-phase (stats sweep + normalize sweep) over row tiles.
        rb = _row_tile()
        nt = pl.cdiv(rows, rb)
        in_spec = pl.BlockSpec((1, rb, lanes), lambda p, ph, t, prm: (p, t, 0))
        # Phase 0 keeps the output block pinned at tile 0 so no garbage write-backs
        # occur while statistics are being accumulated.
        out_spec = pl.BlockSpec((1, rb, lanes), lambda p, ph, t, prm: (p, ph * t, 0))
        kern = functools.partial(_train_tiled_kernel,
                                 count=float(count), eps=float(eps),
                                 rows_total=rows, rows_per_tile=rb)
        out = pl.pallas_call(
            kern,
            grid_spec=pltpu.PrefetchScalarGridSpec(
                num_scalar_prefetch=1, grid=(P, 2, nt),
                in_specs=[in_spec], out_specs=out_spec,
                scratch_shapes=[pltpu.VMEM((1, 1), jnp.float32),
                                pltpu.VMEM((1, 1), jnp.float32)]),
            out_shape=out_shape,
            compiler_params=_mosaic_params(rb * bytes_per_row,
                                           ("parallel", "arbitrary", "arbitrary")),
        )(params, xp)

    # Repack to complex64 (single fused copy under jit).
    out = jnp.transpose(out.reshape(2, C, N, D, H, W), (0, 2, 1, 3, 4, 5))
    return lax.complex(out[0], out[1])


# --------------------------------------------------------------------------------------
# Self-test.
# --------------------------------------------------------------------------------------
def _ref_train(x, wr, br, wi, bi, eps):
    def plane(xp, w, b):
        mean = xp.mean(axis=(0, 2, 3, 4), keepdims=True)
        var = xp.var(axis=(0, 2, 3, 4), keepdims=True)      # biased, PyTorch training
        return ((xp - mean) / jnp.sqrt(var + eps)
                * w.reshape(1, -1, 1, 1, 1) + b.reshape(1, -1, 1, 1, 1))
    return lax.complex(plane(jnp.real(x), wr, br), plane(jnp.imag(x), wi, bi))


def _ref_eval(x, wr, br, wi, bi, rm_r, rv_r, rm_i, rv_i, eps):
    def plane(xp, w, b, rm, rv):
        rm = rm.reshape(1, -1, 1, 1, 1); rv = rv.reshape(1, -1, 1, 1, 1)
        return ((xp - rm) / jnp.sqrt(rv + eps)
                * w.reshape(1, -1, 1, 1, 1) + b.reshape(1, -1, 1, 1, 1))
    return lax.complex(plane(jnp.real(x), wr, br, rm_r, rv_r),
                       plane(jnp.imag(x), wi, bi, rm_i, rv_i))


def _make_inputs(key, N, C, D, H, W):
    kr, ki, kw1, kb1, kw2, kb2 = jax.random.split(key, 6)
    x = lax.complex(
        2.0 * jax.random.normal(kr, (N, C, D, H, W), dtype=jnp.float32) + 0.5,
        0.7 * jax.random.normal(ki, (N, C, D, H, W), dtype=jnp.float32) - 1.0)
    w_r = 1.0 + 0.1 * jax.random.normal(kw1, (C,), dtype=jnp.float32)
    b_r = 0.1 * jax.random.normal(kb1, (C,), dtype=jnp.float32)
    w_i = 1.0 + 0.1 * jax.random.normal(kw2, (C,), dtype=jnp.float32)
    b_i = 0.1 * jax.random.normal(kb2, (C,), dtype=jnp.float32)
    return x, w_r, b_r, w_i, b_i


if __name__ == "__main__":
    eps = 1e-5
    key = jax.random.PRNGKey(0)
    k1, k2 = jax.random.split(key)

    fwd_train = jax.jit(lambda x, wr, br, wi, bi: cbatchnorm3d(
        x, wr, br, wi, bi, eps=eps, training=True))
    fwd_train_tiled = jax.jit(lambda x, wr, br, wi, bi: cbatchnorm3d(
        x, wr, br, wi, bi, eps=eps, training=True, tile_budget_bytes=4096))
    fwd_eval = jax.jit(lambda x, wr, br, wi, bi, rm_r, rv_r, rm_i, rv_i: cbatchnorm3d(
        x, wr, br, wi, bi, eps=eps, training=False,
        running_mean_r=rm_r, running_var_r=rv_r,
        running_mean_i=rm_i, running_var_i=rv_i))

    # ---- training, single-sweep path (whole channel fits the tile budget) ----
    x, w_r, b_r, w_i, b_i = _make_inputs(k1, N=2, C=3, D=4, H=8, W=16)
    y = jax.block_until_ready(fwd_train(x, w_r, b_r, w_i, b_i))
    assert y.shape == x.shape and y.dtype == jnp.complex64
    ref = _ref_train(x, w_r, b_r, w_i, b_i, eps)
    assert float(jnp.max(jnp.abs(y - ref))) < 1e-3

    # ---- training, two-phase tiled path (forced small VMEM budget -> 4 row tiles) ----
    x2, w_r2, b_r2, w_i2, b_i2 = _make_inputs(k2, N=2, C=2, D=16, H=8, W=16)
    y2 = jax.block_until_ready(fwd_train_tiled(x2, w_r2, b_r2, w_i2, b_i2))
    ref2 = _ref_train(x2, w_r2, b_r2, w_i2, b_i2, eps)
    assert float(jnp.max(jnp.abs(y2 - ref2))) < 1e-3

    # ---- eval mode (running statistics) ----
    rm_r = jnp.real(x).mean(axis=(0, 2, 3, 4)); rv_r = jnp.real(x).var(axis=(0, 2, 3, 4))
    rm_i = jnp.imag(x).mean(axis=(0, 2, 3, 4)); rv_i = jnp.imag(x).var(axis=(0, 2, 3, 4))
    y_eval = jax.block_until_ready(
        fwd_eval(x, w_r, b_r, w_i, b_i, rm_r, rv_r, rm_i, rv_i))
    ref_eval = _ref_eval(x, w_r, b_r, w_i, b_i, rm_r, rv_r, rm_i, rv_i, eps)
    assert float(jnp.max(jnp.abs(y_eval - ref_eval))) < 1e-3

    print("KERNEL_OK")
</pallas_src>

<mosaic_0001>
module attributes {stable_mosaic.version = 11 : i64} {
  func.func @_train_single_kernel(%arg0: i32, %arg1: memref<12xf32, #tpu.memory_space<smem>>, %arg2: memref<1x8x128xf32, #tpu.memory_space<vmem>>, %arg3: memref<1x8x128xf32, #tpu.memory_space<vmem>>) attributes {dimension_semantics = [#tpu.dimension_semantics<parallel>], iteration_bounds = array<i64: 6>, scalar_prefetch = 1 : i64, scratch_operands = 0 : i64, tpu.core_type = #tpu.core_type<tc>, window_params = [{transform_indices = @transform_0, window_bounds = array<i64: 1, 8, 128>}, {transform_indices = @transform_1, window_bounds = array<i64: 1, 8, 128>}]} {
    %c0 = arith.constant 0 : index
    %c0_0 = arith.constant 0 : index
    %c0_1 = arith.constant 0 : index
    %0 = vector.load %arg2[%c0, %c0_0, %c0_1] : memref<1x8x128xf32, #tpu.memory_space<vmem>>, vector<1x8x128xf32>
    %1 = vector.shape_cast %0 : vector<1x8x128xf32> to vector<1x1x8x128xf32>
    %cst = arith.constant dense<0.000000e+00> : vector<1xf32>
    %2 = vector.multi_reduction <add>, %1, %cst [1, 2, 3] : vector<1x1x8x128xf32> to vector<1xf32>
    %3 = vector.shape_cast %2 : vector<1xf32> to vector<1x1x1x1xf32>
    %4 = vector.extract %3[0, 0, 0, 0] : f32 from vector<1x1x1x1xf32>
    %cst_2 = arith.constant 9.765625E-4 : f32
    %5 = arith.mulf %4, %cst_2 : f32
    %6 = arith.mulf %0, %0 : vector<1x8x128xf32>
    %7 = vector.shape_cast %6 : vector<1x8x128xf32> to vector<1x1x8x128xf32>
    %cst_3 = arith.constant dense<0.000000e+00> : vector<1xf32>
    %8 = vector.multi_reduction <add>, %7, %cst_3 [1, 2, 3] : vector<1x1x8x128xf32> to vector<1xf32>
    %9 = vector.shape_cast %8 : vector<1xf32> to vector<1x1x1x1xf32>
    %10 = vector.extract %9[0, 0, 0, 0] : f32 from vector<1x1x1x1xf32>
    %cst_4 = arith.constant 9.765625E-4 : f32
    %11 = arith.mulf %10, %cst_4 : f32
    %12 = arith.mulf %5, %5 : f32
    %13 = arith.subf %11, %12 : f32
    %cst_5 = arith.constant 0.000000e+00 : f32
    %14 = arith.maximumf %13, %cst_5 : f32
    %c2_i32 = arith.constant 2 : i32
    %15 = arith.muli %c2_i32, %arg0 : i32
    %16 = arith.index_cast %15 : i32 to index
    %17 = memref.load %arg1[%16] : memref<12xf32, #tpu.memory_space<smem>>
    %cst_6 = arith.constant 9.99999974E-6 : f32
    %18 = arith.addf %14, %cst_6 : f32
    %19 = math.rsqrt %18 : f32
    %20 = arith.mulf %17, %19 : f32
    %c2_i32_7 = arith.constant 2 : i32
    %21 = arith.muli %c2_i32_7, %arg0 : i32
    %c1_i32 = arith.constant 1 : i32
    %22 = arith.addi %21, %c1_i32 : i32
    %23 = arith.index_cast %22 : i32 to index
    %24 = memref.load %arg1[%23] : memref<12xf32, #tpu.memory_space<smem>>
    %25 = arith.mulf %5, %20 : f32
    %26 = arith.subf %24, %25 : f32
    %27 = vector.broadcast %20 : f32 to vector<1x8x128xf32>
    %28 = arith.mulf %0, %27 : vector<1x8x128xf32>
    %29 = vector.broadcast %26 : f32 to vector<1x8x128xf32>
    %30 = arith.addf %28, %29 : vector<1x8x128xf32>
    %c0_8 = arith.constant 0 : index
    %c0_9 = arith.constant 0 : index
    %c0_10 = arith.constant 0 : index
    %31 = vector.load %arg3[%c0_8, %c0_9, %c0_10] : memref<1x8x128xf32, #tpu.memory_space<vmem>>, vector<1x8x128xf32>
    tpu.vector_store %arg3[%c0_8, %c0_9, %c0_10], %30 {strides = array<i32>} : memref<1x8x128xf32, #tpu.memory_space<vmem>>, vector<1x8x128xf32>,
    return
  }
  func.func @transform_0(%arg0: i32, %arg1: memref<12xf32, #tpu.memory_space<smem>>) -> (i32, i32, i32) {
    %c0_i32 = arith.constant 0 : i32
    %c0_i32_0 = arith.constant 0 : i32
    %c0_i32_1 = arith.constant 0 : i32
    return %arg0, %c0_i32, %c0_i32_0 : i32, i32, i32
  }
  func.func @transform_1(%arg0: i32, %arg1: memref<12xf32, #tpu.memory_space<smem>>) -> (i32, i32, i32) {
    %c0_i32 = arith.constant 0 : i32
    %c0_i32_0 = arith.constant 0 : i32
    %c0_i32_1 = arith.constant 0 : i32
    return %arg0, %c0_i32, %c0_i32_0 : i32, i32, i32
  }
}

</mosaic_0001>

<bundles_post_ra>
// kernel: custom-call
= control target key start
LH: loop header
LB: loop body
LE: loop exit
PB: predicated region body
PF: predicated region fallthrough
CT: control target
= control target key end

     0   :  { %2 = vsyncpa [#allocation0], 0  ;;  %s61_s0 = inlined_call_operand.hbm [shape: c64[2,3,4,8,16], index: 0, kind: input, shape index: {}]   ;;  %s62_s1 = inlined_call_operand.vmem [shape: f32[2,3,4,8,16], index: 1, kind: output, shape index: {}]  }
   0x1   :  { %s3_s8 = sshll.u32 %s62_s1, 4  ;;  %s9_s11 = scalar_lea.hbm %s61_s0, 3072  ;;  %s4_s8 = int_to_ptr.vmem [resolvable:$true] %s3_s8 }
   0x2   :  { %p10_p0 = scmp.ne.s32.totalorder %s61_s0, %s9_s11  ;;  %s11_s16 = scalar_lea.hbm %s61_s0, 6144 }
   0x3   :  { %p12_p1 = scmp.lt.u32.totalorder %s11_s16, %s9_s11  ;;  %p13_p2 = scmp.lt.u32.totalorder %s9_s11, %s61_s0 }
   0x5   :  { %p14_p3 = por %p13_p2, %p12_p1 }
   0x7   :  { %p15_p4 = pnand %p14_p3, %p10_p0 }
   0x9   :  { %18 = shalt.err (!%p15_p4)  }
   0xa   :  { %s19_s1 = scalar_lea.vmem %s4_s8, 3072  ;;  %p24_p6 = scmp.lt.s32.totalorder %s4_s8, %s4_s8 }
   0xb   :  { %p20_p5 = scmp.ne.s32.totalorder %s4_s8, %s19_s1  ;;  %p25_p7 = scmp.lt.s32.totalorder %s19_s1, %s19_s1 }
   0xd   :  { %p26_p8 = por %p25_p7, %p24_p6 }
   0xf   :  { %p27_p9 = pnand %p26_p8, %p20_p5 }
  0x11   :  { %30 = shalt.err (!%p27_p9)  }
  0x12   :  { %6 = dma.hbm_to_vmem [thread:$0]  %s61_s0, 3072, %s4_s8, [#allocation0] }
  0x13   :  { %31 = dma.done.wait [#allocation0], 3072  }
  0x14   :  { %32 = vsyncadd [#allocation0], 4294964224 }
  0x15   :  { %8 = vsyncpa [#allocation0], 1 }

// kernel: custom-call.1
= control target key start
LH: loop header
LB: loop body
LE: loop exit
PB: predicated region body
PF: predicated region fallthrough
CT: control target
= control target key end

     0   :  { %s59_s0 = inlined_call_operand.hbm [shape: c64[2,3,4,8,16], index: 0, kind: input, shape index: {}]   ;;  %s60_s1 = inlined_call_operand.vmem [shape: f32[2,3,4,8,16], index: 1, kind: output, shape index: {}]  }
   0x1   :  { %s2_s8 = scalar_lea.hbm %s59_s0, 3072 }
   0x2   :  { %3 = vsyncpa [#allocation0], 0  ;;  %s4_s11 = sshll.u32 %s60_s1, 4  ;;  %s34_s14 = scalar_lea.hbm %s59_s0, 6144  ;;  %s5_s11 = int_to_ptr.vmem [resolvable:$true] %s4_s11 }
   0x3   :  { %p11_p0 = scmp.ne.s32.totalorder %s2_s8, %s34_s14  ;;  %p13_p1 = scmp.lt.u32.totalorder %s2_s8, %s59_s0 }
   0x4   :  { %p14_p2 = scmp.lt.u32.totalorder %s34_s14, %s34_s14  ;;  %p16_p4 = scmp.lt.u32.totalorder %s34_s14, %s2_s8 }
   0x6   :  { %p15_p3 = por %p14_p2, %p13_p1 }
   0x8   :  { %p17_p5 = por %p16_p4, %p15_p3 }
   0xa   :  { %p18_p6 = pnand %p17_p5, %p11_p0 }
   0xc   :  { %21 = shalt.err (!%p18_p6)  }
   0xd   :  { %s22_s17 = scalar_lea.vmem %s5_s11, 3072  ;;  %p27_p8 = scmp.lt.s32.totalorder %s5_s11, %s5_s11 }
   0xe   :  { %p23_p7 = scmp.ne.s32.totalorder %s5_s11, %s22_s17  ;;  %p28_p9 = scmp.lt.s32.totalorder %s22_s17, %s22_s17 }
  0x10   :  { %p29_p10 = por %p28_p9, %p27_p8 }
  0x12   :  { %p30_p11 = pnand %p29_p10, %p23_p7 }
  0x14   :  { %33 = shalt.err (!%p30_p11)  }
  0x15   :  { %7 = dma.hbm_to_vmem [thread:$0]  %s2_s8, 3072, %s5_s11, [#allocation0] }
  0x16   :  { %35 = dma.done.wait [#allocation0], 3072  }
  0x17   :  { %36 = vsyncadd [#allocation0], 4294964224 }
  0x18   :  { %9 = vsyncpa [#allocation0], 1 }

// kernel: custom-call.2
= control target key start
LH: loop header
LB: loop body
LE: loop exit
PB: predicated region body
PF: predicated region fallthrough
CT: control target
= control target key end

     0   :  { %s126_s0 = inlined_call_operand.vmem [shape: f32[2,3,4,8,16], index: 0, kind: input, shape index: {}]   ;;  %s127_s1 = inlined_call_operand.vmem [shape: f32[2,3,4,8,16], index: 1, kind: input, shape index: {}]   ;;  %s128_s2 = inlined_call_operand.hbm [shape: c64[2,3,4,8,16], index: 2, kind: output, shape index: {}]  }
   0x1   :  { %s87_s11 = scalar_lea.hbm %s128_s2, 3072 }
   0x2   :  { %4 = vsyncpa [#allocation0], 0  ;;  %s5_s14 = sshll.u32 %s126_s0, 4  ;;  %s6_s14 = int_to_ptr.vmem [resolvable:$true] %s5_s14 }
   0x3   :  { %s18_s15 = scalar_lea.vmem %s6_s14, 3072  ;;  %p23_p1 = scmp.lt.s32.totalorder %s6_s14, %s6_s14 }
   0x4   :  { %p19_p0 = scmp.ne.s32.totalorder %s6_s14, %s18_s15  ;;  %p24_p2 = scmp.lt.s32.totalorder %s18_s15, %s18_s15 }
   0x6   :  { %p25_p3 = por %p24_p2, %p23_p1 }
   0x8   :  { %p26_p4 = pnand %p25_p3, %p19_p0 }
   0xa   :  { %29 = shalt.err (!%p26_p4)  }
   0xb   :  { %p31_p5 = scmp.ne.s32.totalorder %s128_s2, %s87_s11  ;;  %s32_s0 = scalar_lea.hbm %s128_s2, 6144 }
   0xc   :  { %p33_p6 = scmp.lt.u32.totalorder %s32_s0, %s87_s11  ;;  %p34_p7 = scmp.lt.u32.totalorder %s87_s11, %s128_s2 }
   0xe   :  { %p35_p8 = por %p34_p7, %p33_p6 }
  0x10   :  { %p36_p9 = pnand %p35_p8, %p31_p5 }
  0x12   :  { %39 = shalt.err (!%p36_p9)  }
  0x13   :  { %8 = dma.vmem_to_hbm [thread:$0]  %s6_s14, 3072, %s128_s2, [#allocation0] }
  0x14   :  { %65 = dma.done.wait [#allocation0], 3072  }
  0x15   :  { %66 = vsyncadd [#allocation0], 4294964224 }
  0x16   :  { %10 = vsyncpa [#allocation0], 1 }
  0x17   :  { %11 = vsyncpa [#allocation1], 0  ;;  %s12_s28 = sshll.u32 %s127_s1, 4  ;;  %s13_s28 = int_to_ptr.vmem [resolvable:$true] %s12_s28 }
  0x18   :  { %s40_s29 = scalar_lea.vmem %s13_s28, 3072  ;;  %p45_p11 = scmp.lt.s32.totalorder %s13_s28, %s13_s28 }
  0x19   :  { %p41_p10 = scmp.ne.s32.totalorder %s13_s28, %s40_s29  ;;  %p46_p12 = scmp.lt.s32.totalorder %s40_s29, %s40_s29 }
  0x1b   :  { %p47_p13 = por %p46_p12, %p45_p11 }
  0x1d   :  { %p48_p0 = pnand %p47_p13, %p41_p10 }
  0x1f   :  { %51 = shalt.err (!%p48_p0)  }
  0x20   :  { %p53_p1 = scmp.ne.s32.totalorder %s87_s11, %s32_s0  ;;  %p56_p2 = scmp.lt.u32.totalorder %s32_s0, %s32_s0 }
  0x22   :  { %p57_p3 = por %p56_p2, %p34_p7 }
  0x24   :  { %p59_p4 = por %p57_p3, %p33_p6 }
  0x26   :  { %p60_p5 = pnand %p59_p4, %p53_p1 }
  0x28   :  { %63 = shalt.err (!%p60_p5)  }
  0x29   :  { %15 = dma.vmem_to_hbm [thread:$0]  %s13_s28, 3072, %s87_s11, [#allocation1] }
  0x2a   :  { %67 = dma.done.wait [#allocation1], 3072  }
  0x2b   :  { %68 = vsyncadd [#allocation1], 4294964224 }
  0x2c   :  { %17 = vsyncpa [#allocation1], 1 }

// kernel: _lambda_.1
= control target key start
LH: loop header
LB: loop body
LE: loop exit
PB: predicated region body
PF: predicated region fallthrough
CT: control target
= control target key end

     0   :  { %s312_s0 = inlined_call_operand.vmem [shape: f32[12], index: 0, kind: input, shape index: {}]   ;;  %s313_s1 = inlined_call_operand.vmem [shape: f32[6,8,128], index: 1, kind: input, shape index: {}]   ;;  %s314_s2 = inlined_call_operand.vmem [shape: f32[6,8,128], index: 2, kind: output, shape index: {}]  }
   0x1   :  { %s7_s11 = sshll.u32 %s312_s0, 4  ;;  %s8_s11 = int_to_ptr.vmem [resolvable:$true] %s7_s11 }
   0x2   :  { %s241_s12 = scalar_lea.vmem %s8_s11, 16  ;;  %p246_p1 = scmp.lt.s32.totalorder %s8_s11, %s8_s11 }
   0x3   :  { %p242_p0 = scmp.ne.s32.totalorder %s8_s11, %s241_s12  ;;  %p247_p2 = scmp.lt.s32.totalorder %s241_s12, %s241_s12 }
   0x5   :  { %p248_p3 = por %p247_p2, %p246_p1 }
   0x7   :  { %p249_p4 = pnand %p248_p3, %p242_p0 }
   0x9   :  { %252 = shalt.err (!%p249_p4)  }
   0xa   :  { %s263_s13 = smov [#allocation3]  }
   0xb   :  { %10 = dma.vmem_to_smem %s8_s11, 16, %s263_s13, [#allocation2] }
   0xc   :  { %257 = dma.done.wait [#allocation2], 16 }
   0xd   :  { %258 = vsyncadd [#allocation2], 4294967280 }
   0xe   :  { %12 = sfence }
   0xf   :  { %s283_s14 = smov 0  }
  0x10 LB: > { %s289_s0 = sadd.s32 4294967295, %s261_s14   ;;  %p217_p5 = scmp.ge.s32.totalorder %s261_s14, 1  ;;  %s261_s14 = sphi %s283_s14, %s18_s14  }
  0x11   : > { %p93_p6 = scmp.lt.s32.totalorder %s261_s14, 7 }
  0x13   : > { %p94_p7 = pnand %p217_p5, %p93_p6 }
  0x14   : > { %p111_p8 = scmp.lt.s32.totalorder (!%p94_p7), %s289_s0, 5  ;;  %s264_s26 = smov (!%p94_p7), 0.0  }
  0x15   : > { %97 = sbr.rel (%p94_p7) target bundleno = 320 (0x140), region = 24  ;;  %s220_s29 = sshll.u32 (!%p94_p7), %s289_s0, 1 }
  0x16   : > { %s145_s30 = sld [smem:[#allocation3 + %s220_s29]] (!%p94_p7)  ;;  %s151_s3 = sadd.s32 (!%p94_p7), 1, %s220_s29 }
  0x17   : > { %s152_s4 = sld [smem:[#allocation3 + %s151_s3]] (!%p94_p7) }
  0x1c   : > { %s295_s15 = scalar_select %p111_p8, %s289_s0, 5 }
  0x1e   : > { %s218_s16 = sshll.u32 %s295_s15, 3 }
  0x1f   : > { %s114_s19 = scalar_lea.vmem %s313_s1, %s218_s16  ;;  %s118_s11 = scalar_lea.vmem %s314_s2, %s218_s16 }
  0x20   : > { %v119_v0 = vld [vmem:[%s114_s19] sm:$0xff] }
  0x21   : > { %120 = vadd.xlane.f32.xlu0 %v119_v0  ;;  %v130_v1 = vmul.f32 %v119_v0, %v119_v0 }
  0x25   : > { %131 = vadd.xlane.f32.xlu0 %v130_v1 }
  0xae   : > { %v121_v2 = vpop.xlane.xlu0 %120 }
  0xaf   : > { %v122_v3 = vrot.slane %v121_v2, 4 }
  0xb1   : > { %v123_v4 = vadd.f32 %v122_v3, %v121_v2 }
  0xb2   : > { %v132_v5 = vpop.xlane.xlu0 %131 }
  0xb3   : > { %v124_v6 = vrot.slane %v123_v4, 2  ;;  %v133_v7 = vrot.slane %v132_v5, 4 }
  0xb5   : > { %v134_v8 = vadd.f32 %v133_v7, %v132_v5  ;;  %v125_v9 = vadd.f32 %v124_v6, %v123_v4 }
  0xb7   : > { %v135_v10 = vrot.slane %v134_v8, 2  ;;  %v126_v11 = vrot.slane %v125_v9, 1 }
  0xb9   : > { %v136_v12 = vadd.f32 %v135_v10, %v134_v8  ;;  %v127_v13 = vadd.f32 %v126_v11, %v125_v9 }
  0xbb   : > { %223 = vpush %v127_v13  ;;  %v137_v14 = vrot.slane %v136_v12, 1 }
  0xbd   : > { %v138_v15 = vadd.f32 %v137_v14, %v136_v12 }
  0xbf   : > { %225 = vpush %v138_v15 }
  0xec   : > { %s224_s20 = spop %223 }
  0xed   : > { %s129_s21 = smul.f32 0.0009765625, %s224_s20 }
  0xef   : > { %s141_s22 = smul.f32 %s129_s21, %s129_s21 }
  0xf0   : > { %s226_s23 = spop %225 }
  0xf1   : > { %s140_s24 = smul.f32 0.0009765625, %s226_s23 }
  0xf3   : > { %s142_s25 = ssub.f32 %s140_s24, %s141_s22 }
  0xf5   : > { %s143_s27 = smax.f32 %s264_s26, %s142_s25 }
  0xf6   : > { %s146_s28 = sadd.f32 1e-05, %s143_s27 }
  0xf8   : > { %v147_v16 = vstv %s146_s28 }
  0xf9   : > { %239 = vrsqrt.f32 %v147_v16 }
 0x103   : > { %v240_v17 = vpop.eup %239 }
 0x104   : > { %227 = vpush %v240_v17 }
 0x135   : > { %s228_s5 = spop %227 }
 0x136   : > { %s150_s6 = smul.f32 %s228_s5, %s145_s30 }
 0x138   : > { %s153_s7 = smul.f32 %s150_s6, %s129_s21  ;;  %v155_v18 = vstv %s150_s6 }
 0x139   : > { %v156_v19 = vmul.f32 %v155_v18, %v119_v0 }
 0x13a   : > { %s154_s8 = ssub.f32 %s152_s4, %s153_s7 }
 0x13c   : > { %v157_v20 = vstv %s154_s8 }
 0x13d   : > { %v158_v21 = vadd.f32 %v157_v20, %v156_v19 }
 0x13f   : > { %159 = vst [vmem:[%s118_s11] sm:$0xff] %v158_v21 }
 0x140 PF: > { %s18_s14 = sadd.s32 1, %s261_s14  }
 0x141   : > { %p15_p9 = scmp.ge.s32.totalorder %s18_s14, 8  }
 0x143   :  { %17 = sbr.rel (!%p15_p9) target bundleno = 16 (0x10), region = 54 }

</bundles_post_ra>
